<compile_context>
chip_gen: v5e
topology: v5e:2x2
jax: 0.10.0
libtpu: 0.0.40
codegen_flags: <defaults>
</compile_context>

<pallas_src>
import functools

import jax
import jax.numpy as jnp
from jax import lax
from jax.experimental import pallas as pl
from jax.experimental.pallas import tpu as pltpu

LANES = 128
DEFAULT_BLOCK_BYTES = 2 << 20        # ~2 MiB VMEM per operand per grid step
VMEM_LIMIT_BYTES = 40 << 20          # explicit scoped-VMEM limit (v5e/v6e/v7x safe)


def _round_up(x, m):
    return ((x + m - 1) // m) * m


def _gt_kernel(left_ref, right_ref, *out_refs, norm, total_rows, total_cols,
               mask_rows, mask_cols, want_value, want_penalty):
    refs = list(out_refs)
    value_ref = refs.pop(0) if want_value else None
    penalty_ref = refs.pop(0) if want_penalty else None
    psum_ref = refs.pop(0)

    br, bc = left_ref.shape

    value = right_ref[...] - left_ref[...]
    if want_value:
        value_ref[...] = value

    penalty = jnp.maximum(value, jnp.zeros_like(value))
    if norm == 2:
        penalty = penalty * penalty
    if want_penalty:
        penalty_ref[...] = penalty.astype(penalty_ref.dtype)

    # Per-block partial sum.  The last block along each axis may extend past
    # the logical array; its out-of-bounds rows/lanes hold garbage, so mask
    # them before summing.  (The elementwise outputs above are safe: Pallas
    # only writes back the in-bounds portion of partial blocks.)
    p32 = penalty.astype(jnp.float32)
    if mask_rows:
        rows_left = total_rows - pl.program_id(0) * br
        row_ok = lax.broadcasted_iota(jnp.int32, (br, 1), 0) < rows_left
        p32 = jnp.where(row_ok, p32, 0.0)
    if mask_cols:
        cols_left = total_cols - pl.program_id(1) * bc
        col_ok = lax.broadcasted_iota(jnp.int32, (1, bc), 1) < cols_left
        p32 = jnp.where(col_ok, p32, 0.0)

    s = jnp.sum(p32, axis=0, keepdims=True)        # (1, bc) sublane reduce
    s = jnp.sum(s, axis=1, keepdims=True)          # (1, 1)  lane reduce
    origin = ((lax.broadcasted_iota(jnp.int32, (8, LANES), 0) == 0) &
              (lax.broadcasted_iota(jnp.int32, (8, LANES), 1) == 0))
    psum_ref[0] = origin.astype(jnp.float32) * s   # block sum scattered to (0,0)


def gt_forward(left, right, norm=1, *, block_bytes=DEFAULT_BLOCK_BYTES,
               want_value=True, want_penalty=True):
    """Pallas implementation of neuromancer GT.forward(left, right)."""
    if left.shape != right.shape:
        left, right = jnp.broadcast_arrays(left, right)
    dtype = jnp.result_type(left, right)
    left = left.astype(dtype)
    right = right.astype(dtype)

    orig_shape = left.shape
    n = int(left.size)
    if n == 0:                                    # degenerate: plain jnp
        value = right - left
        penalty = jnp.maximum(value, jnp.zeros_like(value))
        if norm == 2:
            penalty = penalty * penalty
        return (jnp.mean(penalty),
                value if want_value else None,
                penalty if want_penalty else None)

    itemsize = jnp.dtype(dtype).itemsize
    row_mult = {4: 8, 2: 16, 1: 32}.get(itemsize, 8)

    # ---- zero-copy 2-D view --------------------------------------------------
    if n % LANES == 0:
        R, C = n // LANES, LANES                  # lane-dense fast path
    else:
        C = orig_shape[-1] if len(orig_shape) >= 1 else 1
        R = n // C

    # ---- lane (column) blocking ----------------------------------------------
    if C <= LANES:
        bc = C                                    # full extent (allowed)
    else:
        bc = LANES * min(C // LANES, 8)           # <= 1024 lanes per block
    grid_c = pl.cdiv(C, bc)

    # ---- sublane (row) blocking: ~block_bytes of VMEM per operand block -------
    lane_bytes = _round_up(bc, LANES) * itemsize
    target_rows = max(row_mult, (block_bytes // lane_bytes) // row_mult * row_mult)
    if R <= row_mult:
        br = R                                    # full extent (allowed)
    else:
        br = min(target_rows, (R // row_mult) * row_mult)
        if grid_c == 1 and R > 2 * row_mult:
            # split mid-size tensors into >= 2 blocks so both v7x TCs get work
            br = min(br, _round_up((R + 1) // 2, row_mult))
    grid_r = pl.cdiv(R, br)
    nb = grid_r * grid_c

    mask_rows = (R % br) != 0
    mask_cols = (C % bc) != 0

    l2 = left.reshape(R, C)
    r2 = right.reshape(R, C)

    blk = pl.BlockSpec((br, bc), lambda i, j: (i, j))
    psum_spec = pl.BlockSpec((1, 8, LANES), lambda i, j: (i * grid_c + j, 0, 0))

    out_shape, out_specs = [], []
    if want_value:
        out_shape.append(jax.ShapeDtypeStruct((R, C), dtype))
        out_specs.append(blk)
    if want_penalty:
        out_shape.append(jax.ShapeDtypeStruct((R, C), dtype))
        out_specs.append(blk)
    out_shape.append(jax.ShapeDtypeStruct((nb, 8, LANES), jnp.float32))
    out_specs.append(psum_spec)

    kernel = functools.partial(
        _gt_kernel, norm=norm, total_rows=R, total_cols=C,
        mask_rows=mask_rows, mask_cols=mask_cols,
        want_value=want_value, want_penalty=want_penalty)

    flops = (4 if norm == 2 else 3) * n
    bytes_accessed = ((2 + int(want_value) + int(want_penalty)) * n * itemsize
                      + nb * 8 * LANES * 4)

    outs = pl.pallas_call(
        kernel,
        out_shape=tuple(out_shape),
        grid=(grid_r, grid_c),
        in_specs=[blk, blk],
        out_specs=tuple(out_specs),
        compiler_params=pltpu.CompilerParams(
            dimension_semantics=("parallel", "parallel"),
            vmem_limit_bytes=VMEM_LIMIT_BYTES),
        cost_estimate=pl.CostEstimate(
            flops=flops, transcendentals=0, bytes_accessed=bytes_accessed),
    )(l2, r2)

    outs = list(outs)
    value = outs.pop(0).reshape(orig_shape) if want_value else None
    penalty = outs.pop(0).reshape(orig_shape) if want_penalty else None
    psum = outs.pop(0)
    loss = jnp.sum(psum) / n                      # tiny epilogue reduction (f32)
    return loss, value, penalty


def gt_reference(left, right, norm=1):
    value = right - left
    penalty = jnp.maximum(value, jnp.zeros_like(value))
    if norm == 2:
        penalty = penalty ** 2
    return jnp.mean(penalty), value, penalty


def _check(left, right, norm, **kw):
    loss, value, penalty = gt_forward(left, right, norm=norm, **kw)
    jax.block_until_ready((loss, value, penalty))
    loss_r, value_r, penalty_r = gt_reference(left, right, norm=norm)
    assert jnp.allclose(loss, loss_r, atol=1e-5, rtol=1e-5), (loss, loss_r)
    assert jnp.allclose(value, value_r, atol=1e-6, rtol=1e-6)
    assert jnp.allclose(penalty, penalty_r, atol=1e-6, rtol=1e-6)
    assert loss.ndim == 0
    assert value.shape == left.shape and penalty.shape == left.shape


if __name__ == "__main__":
    key = jax.random.PRNGKey(0)
    k = jax.random.split(key, 8)

    # canonical constraint tensor (NCHW-like), n = 2048 (lane-aligned fast path)
    x_shape = (2, 4, 16, 16)
    left = jax.random.normal(k[0], x_shape, dtype=jnp.float32)    # g(x)
    right = jax.random.normal(k[1], x_shape, dtype=jnp.float32)   # b
    for norm in (1, 2):
        _check(left, right, norm)                       # single-block path
        _check(left, right, norm, block_bytes=4096)     # force multi-block path

    # lane-aligned but row-ragged shape: exercises in-kernel row mask, no padding
    z_shape = (2, 4, 20, 16)                            # n = 2560, R = 20
    left_z = jax.random.normal(k[2], z_shape, dtype=jnp.float32)
    right_z = jax.random.normal(k[3], z_shape, dtype=jnp.float32)
    for norm in (1, 2):
        _check(left_z, right_z, norm)

    # lane-ragged small tensor: slow path keeps the last dim as lanes, zero copies
    y_shape = (2, 3, 5, 7)
    left_y = jax.random.normal(k[4], y_shape, dtype=jnp.float32)
    right_y = jax.random.normal(k[5], y_shape, dtype=jnp.float32)
    for norm in (1, 2):
        _check(left_y, right_y, norm)

    # lane-ragged wide tensor: exercises partial lane blocks + in-kernel col mask
    w_shape = (4, 200)
    left_w = jax.random.normal(k[6], w_shape, dtype=jnp.float32)
    right_w = jax.random.normal(k[7], w_shape, dtype=jnp.float32)
    for norm in (1, 2):
        _check(left_w, right_w, norm)

    # loss-only path (drops both elementwise HBM writes)
    loss_only, v_none, p_none = gt_forward(left, right, norm=1,
                                           want_value=False, want_penalty=False)
    jax.block_until_ready(loss_only)
    loss_ref, _, _ = gt_reference(left, right, norm=1)
    assert v_none is None and p_none is None
    assert jnp.allclose(loss_only, loss_ref, atol=1e-5, rtol=1e-5)

    print("KERNEL_OK")
</pallas_src>

<mosaic_0001>
module attributes {stable_mosaic.version = 11 : i64} {
  func.func @_gt_kernel(%arg0: i32, %arg1: i32, %arg2: memref<16x128xf32, #tpu.memory_space<vmem>>, %arg3: memref<16x128xf32, #tpu.memory_space<vmem>>, %arg4: memref<16x128xf32, #tpu.memory_space<vmem>>, %arg5: memref<16x128xf32, #tpu.memory_space<vmem>>, %arg6: memref<1x8x128xf32, #tpu.memory_space<vmem>>) attributes {dimension_semantics = [#tpu.dimension_semantics<parallel>, #tpu.dimension_semantics<parallel>], iteration_bounds = array<i64: 1, 1>, scalar_prefetch = 0 : i64, scratch_operands = 0 : i64, tpu.core_type = #tpu.core_type<tc>, window_params = [{transform_indices = @transform_0, window_bounds = array<i64: 16, 128>}, {transform_indices = @transform_1, window_bounds = array<i64: 16, 128>}, {transform_indices = @transform_2, window_bounds = array<i64: 16, 128>}, {transform_indices = @transform_3, window_bounds = array<i64: 16, 128>}, {transform_indices = @transform_4, window_bounds = array<i64: 1, 8, 128>}]} {
    %c0 = arith.constant 0 : index
    %c0_0 = arith.constant 0 : index
    %0 = vector.load %arg3[%c0, %c0_0] : memref<16x128xf32, #tpu.memory_space<vmem>>, vector<16x128xf32>
    %c0_1 = arith.constant 0 : index
    %c0_2 = arith.constant 0 : index
    %1 = vector.load %arg2[%c0_1, %c0_2] : memref<16x128xf32, #tpu.memory_space<vmem>>, vector<16x128xf32>
    %2 = arith.subf %0, %1 : vector<16x128xf32>
    %c0_3 = arith.constant 0 : index
    %c0_4 = arith.constant 0 : index
    %3 = vector.load %arg4[%c0_3, %c0_4] : memref<16x128xf32, #tpu.memory_space<vmem>>, vector<16x128xf32>
    tpu.vector_store %arg4[%c0_3, %c0_4], %2 {strides = array<i32>} : memref<16x128xf32, #tpu.memory_space<vmem>>, vector<16x128xf32>,
    %cst = arith.constant 0.000000e+00 : f32
    %4 = vector.broadcast %cst : f32 to vector<16x128xf32>
    %5 = arith.maximumf %2, %4 : vector<16x128xf32>
    %c0_5 = arith.constant 0 : index
    %c0_6 = arith.constant 0 : index
    %6 = vector.load %arg5[%c0_5, %c0_6] : memref<16x128xf32, #tpu.memory_space<vmem>>, vector<16x128xf32>
    tpu.vector_store %arg5[%c0_5, %c0_6], %5 {strides = array<i32>} : memref<16x128xf32, #tpu.memory_space<vmem>>, vector<16x128xf32>,
    %cst_7 = arith.constant dense<0.000000e+00> : vector<128xf32>
    %7 = vector.multi_reduction <add>, %5, %cst_7 [0] : vector<16x128xf32> to vector<128xf32>
    %8 = vector.shape_cast %7 : vector<128xf32> to vector<1x128xf32>
    %cst_8 = arith.constant dense<0.000000e+00> : vector<1xf32>
    %9 = vector.multi_reduction <add>, %8, %cst_8 [1] : vector<1x128xf32> to vector<1xf32>
    %10 = vector.shape_cast %9 : vector<1xf32> to vector<1x1xf32>
    %11 = tpu.iota {dimensions = array<i32: 0>} : vector<8x128xi32>
    %c0_i32 = arith.constant 0 : i32
    %12 = vector.broadcast %c0_i32 : i32 to vector<8x128xi32>
    %13 = arith.cmpi eq, %11, %12 : vector<8x128xi32>
    %14 = tpu.iota {dimensions = array<i32: 1>} : vector<8x128xi32>
    %c0_i32_9 = arith.constant 0 : i32
    %15 = vector.broadcast %c0_i32_9 : i32 to vector<8x128xi32>
    %16 = arith.cmpi eq, %14, %15 : vector<8x128xi32>
    %17 = arith.andi %13, %16 : vector<8x128xi1>
    %18 = arith.extui %17 : vector<8x128xi1> to vector<8x128xi32>
    %19 = arith.sitofp %18 : vector<8x128xi32> to vector<8x128xf32>
    %20 = vector.broadcast %10 : vector<1x1xf32> to vector<8x128xf32>
    %21 = arith.mulf %19, %20 : vector<8x128xf32>
    %c0_10 = arith.constant 0 : index
    %c0_11 = arith.constant 0 : index
    %c0_12 = arith.constant 0 : index
    %22 = vector.load %arg6[%c0_10, %c0_11, %c0_12] : memref<1x8x128xf32, #tpu.memory_space<vmem>>, vector<1x8x128xf32>
    %23 = vector.shape_cast %22 : vector<1x8x128xf32> to vector<8x128xf32>
    %24 = vector.shape_cast %21 : vector<8x128xf32> to vector<1x8x128xf32>
    tpu.vector_store %arg6[%c0_10, %c0_11, %c0_12], %24 {strides = array<i32>} : memref<1x8x128xf32, #tpu.memory_space<vmem>>, vector<1x8x128xf32>,
    return
  }
  func.func @transform_0(%arg0: i32, %arg1: i32) -> (i32, i32) {
    %c0_i32 = arith.constant 0 : i32
    return %arg0, %arg1 : i32, i32
  }
  func.func @transform_1(%arg0: i32, %arg1: i32) -> (i32, i32) {
    %c0_i32 = arith.constant 0 : i32
    return %arg0, %arg1 : i32, i32
  }
  func.func @transform_2(%arg0: i32, %arg1: i32) -> (i32, i32) {
    %c0_i32 = arith.constant 0 : i32
    return %arg0, %arg1 : i32, i32
  }
  func.func @transform_3(%arg0: i32, %arg1: i32) -> (i32, i32) {
    %c0_i32 = arith.constant 0 : i32
    return %arg0, %arg1 : i32, i32
  }
  func.func @transform_4(%arg0: i32, %arg1: i32) -> (i32, i32, i32) {
    %c1_i32 = arith.constant 1 : i32
    %0 = arith.muli %arg0, %c1_i32 : i32
    %1 = arith.addi %0, %arg1 : i32
    %c0_i32 = arith.constant 0 : i32
    %c0_i32_0 = arith.constant 0 : i32
    %c0_i32_1 = arith.constant 0 : i32
    return %1, %c0_i32, %c0_i32_0 : i32, i32, i32
  }
}

</mosaic_0001>

<bundles_post_ra>
// kernel: tpu_custom_call.1
= control target key start
LH: loop header
LB: loop body
LE: loop exit
PB: predicated region body
PF: predicated region fallthrough
CT: control target
= control target key end

     0   :  { %10 = vsyncpa [#allocation3], 0  ;;  %s334_s0 = inlined_call_operand.hbm [shape: f32[16,128], index: 0, kind: input, shape index: {}]   ;;  %s335_s1 = inlined_call_operand.hbm [shape: f32[16,128], index: 1, kind: input, shape index: {}]   ;;  %s336_s2 = inlined_call_operand.hbm [shape: f32[16,128], index: 2, kind: output, shape index: {0}]   ;;  %s337_s3 = inlined_call_operand.hbm [shape: f32[16,128], index: 3, kind: output, shape index: {1}]   ;;  %s338_s4 = inlined_call_operand.hbm [shape: f32[1,8,128], index: 4, kind: output, shape index: {2}]  }
   0x1   :  { %11 = vsyncpa [#allocation6], 0 }
   0x2   :  { %12 = vsyncpa [#allocation4], 0 }
   0x3   :  { %13 = vsyncpa [#allocation9], 0  ;;  %s18_s17 = sshll.u32 %s334_s0, 4  ;;  %s274_s18 = smov [#allocation2]   ;;  %s19_s17 = int_to_ptr.hbm [resolvable:$true] %s18_s17 }
   0x4   :  { %s20_s19 = sshll.u32 %s274_s18, 4  ;;  %s31_s22 = sshll.u32 %s335_s1, 4  ;;  %s21_s19 = int_to_ptr.vmem [resolvable:$true] %s20_s19  ;;  %s32_s22 = int_to_ptr.hbm [resolvable:$true] %s31_s22 }
   0x5   :  { %s275_s23 = smov 128   ;;  %s276_s24 = smov 8  }
   0x6   :  { %26 = dma.hbm_to_vmem [thread:$0]  %s19_s17, 256, %s21_s19, [#allocation3], %s275_s23, %s275_s23, %s276_s24  }
   0x7   :  { %s277_s25 = smov [#allocation5]  }
   0x8   :  { %s33_s26 = sshll.u32 %s277_s25, 4  ;;  %s34_s26 = int_to_ptr.vmem [resolvable:$true] %s33_s26 }
   0x9   :  { %39 = dma.hbm_to_vmem [thread:$0]  %s32_s22, 256, %s34_s26, [#allocation6], %s275_s23, %s275_s23, %s276_s24  }
   0xa   :  { %266 = dma.done.wait [#allocation3], 256  }
   0xb   :  { %267 = vsyncadd [#allocation3], 4294967040 }
   0xc   :  { %268 = dma.done.wait [#allocation6], 256  }
   0xd   :  { %269 = vsyncadd [#allocation6], 4294967040  ;;  %v49_v0 = vld [vmem:[#allocation5] sm:$0xff]  ;;  %v50_v1 = vld [vmem:[#allocation5 + $0x8] sm:$0xff]  ;;  %s278_s0 = smov [#allocation8]   ;;  %s100_s29 = sshll.u32 %s337_s3, 4  ;;  %v70_v15 = vlaneseq  ;;  %s101_s29 = int_to_ptr.hbm [resolvable:$true] %s100_s29 }
   0xe   :  { %v51_v2 = vld [vmem:[#allocation2] sm:$0xff]  ;;  %v52_v3 = vld [vmem:[#allocation2 + $0x8] sm:$0xff]  ;;  %s98_s1 = sshll.u32 %s278_s0, 4  ;;  %s87_s6 = sshll.u32 %s336_s2, 4  ;;  %v280_v18 = vmov 0.0   ;;  %s99_s1 = int_to_ptr.vmem [resolvable:$true] %s98_s1  ;;  %s88_s6 = int_to_ptr.hbm [resolvable:$true] %s87_s6 }
   0xf   :  { %v53_v4 = vsub.f32 %v49_v0, %v51_v2  ;;  %v54_v5 = vsub.f32 %v50_v1, %v52_v3  ;;  %s279_s7 = smov [#allocation7]   ;;  %v71_v16 = vshrl.u32 %v70_v15, 7  ;;  %v74_v17 = vand.u32 127, %v70_v15  ;;  %s281_s2 = smov [#allocation10]  }
  0x10   :  { %s85_s8 = sshll.u32 %s279_s7, 4  ;;  %s115_s3 = sshll.u32 %s281_s2, 4  ;;  %s86_s8 = int_to_ptr.vmem [resolvable:$true] %s85_s8  ;;  %s116_s3 = int_to_ptr.vmem [resolvable:$true] %s115_s3 }
  0x11   :  { %v57_v6 = vmax.f32 %v53_v4, 0.0  ;;  %55 = vst [vmem:[#allocation7] sm:$0xff] %v53_v4  ;;  %v58_v7 = vmax.f32 %v54_v5, 0.0  ;;  %vm72_vm0 = vcmp.eq.s32.totalorder %v71_v16, 0  ;;  %vm75_vm1 = vcmp.eq.s32.totalorder %v74_v17, 0  ;;  %s117_s11 = sshll.u32 %s338_s4, 4  ;;  %s118_s11 = int_to_ptr.hbm [resolvable:$true] %s117_s11 }
  0x12   :  { %56 = vst [vmem:[#allocation7 + $0x8] sm:$0xff] %v54_v5  ;;  %vm76_vm2 = vmand %vm72_vm0, %vm75_vm1 }
  0x13   :  { %59 = vst [vmem:[#allocation8] sm:$0xff] %v57_v6  ;;  %v61_v8 = vadd.f32 %v58_v7, %v57_v6  ;;  %93 = dma.vmem_to_hbm [thread:$0]  %s86_s8, 256, %s88_s6, [#allocation4], %s275_s23, %s275_s23, %s276_s24   ;;  %v137_v19 = vsel %vm76_vm2, 1.0, %v280_v18 }
  0x14   :  { %60 = vst [vmem:[#allocation8 + $0x8] sm:$0xff] %v58_v7 }
  0x15   :  { %v62_v9 = vrot.slane %v61_v8, 4  ;;  %106 = dma.vmem_to_hbm [thread:$0]  %s99_s1, 256, %s101_s29, [#allocation9], %s275_s23, %s275_s23, %s276_s24  }
  0x17   :  { %v63_v10 = vadd.f32 %v62_v9, %v61_v8 }
  0x19   :  { %v64_v11 = vrot.slane %v63_v10, 2 }
  0x1b   :  { %v65_v12 = vadd.f32 %v64_v11, %v63_v10 }
  0x1d   :  { %v66_v13 = vrot.slane %v65_v12, 1 }
  0x1f   :  { %v67_v14 = vadd.f32 %v66_v13, %v65_v12 }
  0x21   :  { %68 = vadd.xlane.f32.xlu0 %v67_v14 }
  0x94   :  { %v69_v20 = vpop.xlane.xlu0 %68 }
  0x95   :  { %v79_v21 = vmul.f32 %v137_v19, %v69_v20 }
  0x97   :  { %80 = vst [vmem:[#allocation10] sm:$0xff] %v79_v21 }
  0x98   :  { %120 = dma.vmem_to_hbm [thread:$0]  %s116_s3, 128, %s118_s11, [#allocation9]  }
  0x99   :  { %270 = dma.done.wait [#allocation4], 256  }
  0x9a   :  { %271 = vsyncadd [#allocation4], 4294967040 }
  0x9b   :  { %272 = dma.done.wait [#allocation9], 384  }
  0x9c   :  { %273 = vsyncadd [#allocation9], 4294966912 }
  0x9d   :  { %133 = vsyncpa [#allocation3], 1 }
  0x9e   :  { %134 = vsyncpa [#allocation6], 1 }
  0x9f   :  { %135 = vsyncpa [#allocation4], 1 }
  0xa0   :  { %136 = vsyncpa [#allocation9], 1 }

</bundles_post_ra>
